<compile_context>
chip_gen: v5e
topology: v5e:2x2
jax: 0.10.0
libtpu: 0.0.40
codegen_flags: <defaults>
</compile_context>

<pallas_src>
import numpy as np
import jax
import jax.numpy as jnp
from jax.experimental import pallas as pl
from jax.experimental.pallas import tpu as pltpu


def _round_up(x, m):
    return ((x + m - 1) // m) * m


# ----------------------------------------------------------------------------
# Kernel: B configurations per grid step.
#   f_ref : [B, n_pad, D]          f32  node features (rows zero-padded)
#   k_ref : [D, 9*D]               f32  k2[d, o*D+e] = Ksym[o, d, e] (resident)
#   o_ref : [B, n_pad, 9*n_pad]    f32  o_ref[c, i, o*n_pad + j] = H_c[o][i, j]
# ----------------------------------------------------------------------------
def _make_config_hessian_kernel(B, n_pad, D):
    def kernel(f_ref, k_ref, o_ref):
        f3 = f_ref[...]                                        # [B, n_pad, D]
        f2 = f3.reshape(B * n_pad, D)                          # cheap: merge sublanes

        # Stage 1 — one MXU push for the whole config batch:
        #   A[r, o*D + e] = sum_d F[r, d] * Ksym[o, d, e]
        a = jnp.dot(f2, k_ref[...],
                    preferred_element_type=jnp.float32)        # [B*n_pad, 9*D]

        # Stage 2 — per cartesian component o, one config-batched matmul
        # (same bqd,bkd->bqk pattern as flash attention):
        #   H[c, i, j] = sum_e A[c, i, o*D + e] * F[c, j, e]
        # The component index lands in the lane axis of the output block, so
        # the block written back to HBM is lane-dense (9*n_pad wide).
        for o in range(9):
            a_o = a[:, o * D:(o + 1) * D].reshape(B, n_pad, D)
            h_o = jax.lax.dot_general(
                a_o, f3,
                dimension_numbers=(((2,), (2,)), ((0,), (0,))),
                preferred_element_type=jnp.float32)            # [B, n_pad, n_pad]
            o_ref[:, :, o * n_pad:(o + 1) * n_pad] = h_o
    return kernel


def hessian_block_matmul(f_pad, k2, *, B):
    """f_pad: [C_pad, n_pad, D] f32, k2: [D, 9*D] f32 -> [C_pad, n_pad, 9*n_pad] f32."""
    C_pad, n_pad, D = f_pad.shape
    assert C_pad % B == 0
    grid = (C_pad // B,)

    # VMEM sizing: double-buffered in/out blocks + intermediate + weights.
    f_block = B * n_pad * D * 4
    out_block = B * n_pad * 9 * n_pad * 4
    a_bytes = B * n_pad * 9 * D * 4
    need = 2 * (f_block + out_block) + 2 * a_bytes + k2.size * 4 + (4 << 20)
    vmem_limit = int(min(max(need, 32 << 20), 100 << 20))
    # TODO(synk): for very large configurations (n_pad ~ 1024, v7x 64 MiB VMEM)
    #             add (row-tile, col-tile) grid axes for the [n, n] output
    #             instead of one block per config batch.

    kernel = _make_config_hessian_kernel(B, n_pad, D)
    return pl.pallas_call(
        kernel,
        out_shape=jax.ShapeDtypeStruct((C_pad, n_pad, 9 * n_pad), jnp.float32),
        grid_spec=pltpu.PrefetchScalarGridSpec(
            num_scalar_prefetch=0,
            grid=grid,
            in_specs=[
                pl.BlockSpec((B, n_pad, D), lambda g: (g, 0, 0)),
                pl.BlockSpec((D, 9 * D), lambda g: (0, 0)),    # resident weights
            ],
            out_specs=pl.BlockSpec((B, n_pad, 9 * n_pad), lambda g: (g, 0, 0)),
        ),
        compiler_params=pltpu.CompilerParams(
            dimension_semantics=("parallel",),                 # config batches across TCs
            vmem_limit_bytes=vmem_limit),
    )(f_pad, k2)


# ----------------------------------------------------------------------------
# Parameter construction (deterministic, synthetic).
# FullyConnectedTensorProduct("MULx1e", "MULx1e", "1x0e+1x1e+1x2e") has exactly
# three weight paths W0/W1/W2 of shape [MUL, MUL]; they are folded with the
# (Schur-unique) intertwiners into a single [9, D, D] bilinear kernel.
# TODO(synk): exact e3nn w3j / change-of-basis per-irrep scalars and the e3nn
#             weight-init distribution are absorbed into these synthetic weights.
# ----------------------------------------------------------------------------
def build_bilinear_weights(key, mul):
    D = 3 * mul
    k0, k1, k2 = jax.random.split(key, 3)
    w0 = jax.random.normal(k0, (mul, mul), jnp.float32)
    w1 = jax.random.normal(k1, (mul, mul), jnp.float32)
    w2 = jax.random.normal(k2, (mul, mul), jnp.float32)
    scale = 1.0 / np.sqrt(mul * mul)  # e3nn-style fan-in normalization

    eye = np.eye(3, dtype=np.float32)
    p_trace = np.einsum("ab,ij->abij", eye, eye) / 3.0
    d_ai_bj = np.einsum("ai,bj->abij", eye, eye)
    d_aj_bi = np.einsum("aj,bi->abij", eye, eye)
    p_anti = 0.5 * (d_ai_bj - d_aj_bi)
    p_sym = 0.5 * (d_ai_bj + d_aj_bi) - p_trace

    K = (jnp.einsum("uv,abij->abuivj", w0, jnp.asarray(p_trace))
         + jnp.einsum("uv,abij->abuivj", w1, jnp.asarray(p_anti))
         + jnp.einsum("uv,abij->abuivj", w2, jnp.asarray(p_sym))) * scale
    return K.reshape(9, D, D).astype(jnp.float32)


def fold_symmetrization(K):
    """Ksym[a*3+b, d, e] = 0.5 * (K[a*3+b, d, e] + K[b*3+a, e, d]).

    Exact replacement for the explicit (H + H^T)/2 pass, valid because the
    hessian layout enumerates the complete (i, j) square per configuration.
    """
    D = K.shape[1]
    K4 = K.reshape(3, 3, D, D)
    Kt = jnp.transpose(K4, (1, 0, 3, 2))
    return (0.5 * (K4 + Kt)).reshape(9, D, D)


# ----------------------------------------------------------------------------
# Host-side glue (mirrors the PyTorch advanced indexing / natoms loop).
# ----------------------------------------------------------------------------
def irreps_to_hessian_forward(data, K, *, symmetrize=True):
    # NOTE: assumes data["hessian_layout"] enumerates the complete (i, j) atom
    # square per configuration in row-major order (how eigenn builds it).  The
    # Ksym fold relies on this; a sparse/partial layout would need the explicit
    # partner pass instead.
    node_feats = jnp.asarray(data["node_features"])          # [N, D]
    ptr = np.asarray(data["ptr"], dtype=np.int64)
    natoms = ptr[1:] - ptr[:-1]                              # [C]
    C = int(natoms.shape[0])
    N, D = node_feats.shape
    P = int(np.sum(natoms ** 2))

    n_pad = int(max(8, _round_up(int(natoms.max()), 8)))
    # TODO(synk): bucket configurations by size (per-bucket n_pad) to avoid
    #             quadratic padded-writeback waste when natoms varies a lot.

    # Configurations per grid step: amortize per-step overhead (target >=256
    # feature rows per stage-1 matmul) while keeping the double-buffered f32
    # output block within a ~24 MiB VMEM budget (v7x-safe).
    b_overhead = max(1, (256 + n_pad - 1) // n_pad)
    b_vmem = max(1, (24 << 20) // max(1, n_pad * 9 * n_pad * 4 * 2))
    B = int(max(1, min(C, b_overhead, b_vmem)))
    C_pad = _round_up(C, B)

    # Fold (H + H^T)/2 into the weights, pre-transpose so stage 1 is a plain
    # row-major matmul:  k2[d, o*D + e] = Ksym[o, d, e].
    Keff = fold_symmetrization(K) if symmetrize else K       # [9, D, D]
    k2 = jnp.transpose(Keff, (1, 0, 2)).reshape(D, 9 * D).astype(jnp.float32)

    # Vectorized pack: one gather (index map built in numpy), no per-config
    # XLA ops.  Pad rows / pad configs point at an all-zero feature row.
    atom_cfg = np.repeat(np.arange(C), natoms)
    atom_loc = np.arange(N) - np.repeat(ptr[:-1], natoms)
    src = np.full((C_pad, n_pad), N, dtype=np.int32)
    src[atom_cfg, atom_loc] = np.arange(N, dtype=np.int32)
    feats_ext = jnp.concatenate(
        [node_feats.astype(jnp.float32), jnp.zeros((1, D), jnp.float32)], axis=0)
    f_pad = feats_ext[jnp.asarray(src)]                       # [C_pad, n_pad, D] f32

    out = hessian_block_matmul(f_pad, k2, B=B)                # [C_pad, n_pad, 9*n_pad]

    # Vectorized unpack to hessian_layout order (row-major (i, j) per config):
    # one advanced-indexing gather.
    sizes = natoms ** 2
    pair_cfg = np.repeat(np.arange(C), sizes)
    pair_off = np.repeat(np.concatenate([[0], np.cumsum(sizes)[:-1]]), sizes)
    pair_loc = np.arange(P) - pair_off
    pair_n = natoms[pair_cfg]
    pi = (pair_loc // pair_n).astype(np.int32)
    pj = (pair_loc % pair_n).astype(np.int32)
    out4 = out.reshape(C_pad, n_pad, 9, n_pad)
    cart = out4[jnp.asarray(pair_cfg.astype(np.int32)),
                jnp.asarray(pi), :, jnp.asarray(pj)]          # [P, 9]
    cart = cart.reshape(P, 3, 3)

    result = dict(data)
    result["node_features"] = cart                            # out_field defaults to field
    return result


# ----------------------------------------------------------------------------
# Pure numpy (float64) reference — unfused tensor product + explicit partner
# symmetrization — for verification of the Ksym fold and the restructuring.
# ----------------------------------------------------------------------------
def partner_indices_np(ptr):
    idx, offset = [], 0
    for a, b in zip(ptr[:-1], ptr[1:]):
        n = int(b) - int(a)
        ii, jj = np.meshgrid(np.arange(n), np.arange(n), indexing="ij")
        idx.append(offset + (jj * n + ii).reshape(-1))
        offset += n * n
    return np.concatenate(idx).astype(np.int32)


def reference_forward_np(node_feats, layout, ptr, K):
    f = np.asarray(node_feats, np.float64)
    Kn = np.asarray(K, np.float64)
    lay = np.asarray(layout)
    fr, fc = f[lay[:, 0]], f[lay[:, 1]]
    cart = np.einsum("pd,ode,pe->po", fr, Kn, fc).reshape(-1, 3, 3)
    partner = partner_indices_np(ptr)
    cart = 0.5 * (cart + np.transpose(cart[partner], (0, 2, 1)))
    return cart


if __name__ == "__main__":
    key = jax.random.PRNGKey(0)
    MUL = 8                                   # irreps_in = "8x1e" -> D = 24
    natoms = [12, 7]                          # two configurations (uneven sizes)
    ptr = np.concatenate([[0], np.cumsum(natoms)]).astype(np.int32)
    N = int(ptr[-1])
    D = 3 * MUL

    k_feat, k_w = jax.random.split(key)
    node_feats = jax.random.normal(k_feat, (N, D), jnp.float32)

    # hessian_layout: all (i, j) atom pairs per configuration, row-major.
    rows, cols = [], []
    for a, b in zip(ptr[:-1], ptr[1:]):
        ii, jj = np.meshgrid(np.arange(a, b), np.arange(a, b), indexing="ij")
        rows.append(ii.reshape(-1))
        cols.append(jj.reshape(-1))
    layout = jnp.asarray(
        np.stack([np.concatenate(rows), np.concatenate(cols)], axis=1),
        dtype=jnp.int32,
    )

    K = build_bilinear_weights(k_w, MUL)

    data = {"node_features": node_feats, "hessian_layout": layout, "ptr": ptr}
    out = irreps_to_hessian_forward(data, K, symmetrize=True)
    hess_blocks = jax.block_until_ready(out["node_features"])   # [P, 3, 3]

    ref = reference_forward_np(node_feats, layout, ptr, K)
    # f32 operands with f32 accumulation (no bf16 re-quantization) -> tighter
    # tolerance than the previous bf16 version.
    np.testing.assert_allclose(np.asarray(hess_blocks), ref, atol=5e-2, rtol=2e-2)

    print("KERNEL_OK")
</pallas_src>

<mosaic_0001>
module attributes {stable_mosaic.version = 11 : i64} {
  func.func @kernel(%arg0: i32, %arg1: memref<2x16x24xf32, #tpu.memory_space<vmem>>, %arg2: memref<24x216xf32, #tpu.memory_space<vmem>>, %arg3: memref<2x16x144xf32, #tpu.memory_space<vmem>>) attributes {dimension_semantics = [#tpu.dimension_semantics<parallel>], iteration_bounds = array<i64: 1>, scalar_prefetch = 0 : i64, scratch_operands = 0 : i64, tpu.core_type = #tpu.core_type<tc>, window_params = [{transform_indices = @transform_0, window_bounds = array<i64: 2, 16, 24>}, {pipeline_mode = #tpu.pipeline_mode<synchronous>, transform_indices = @transform_1, window_bounds = array<i64: 24, 216>}, {transform_indices = @transform_2, window_bounds = array<i64: 2, 16, 144>}]} {
    %c0 = arith.constant 0 : index
    %c0_0 = arith.constant 0 : index
    %c0_1 = arith.constant 0 : index
    %0 = vector.load %arg1[%c0, %c0_0, %c0_1] : memref<2x16x24xf32, #tpu.memory_space<vmem>>, vector<2x16x24xf32>
    %1 = vector.shape_cast %0 : vector<2x16x24xf32> to vector<32x24xf32>
    %c0_2 = arith.constant 0 : index
    %c0_3 = arith.constant 0 : index
    %2 = vector.load %arg2[%c0_2, %c0_3] : memref<24x216xf32, #tpu.memory_space<vmem>>, vector<24x216xf32>
    %cst = arith.constant dense<0.000000e+00> : vector<32x216xf32>
    %3 = tpu.matmul %1, %2, %cst {dimension_numbers = #tpu.dot_dimension_numbers<[1], [0], [0], [1], [0, 0, 1, 1], [], []>} : vector<32x24xf32>, vector<24x216xf32>, vector<32x216xf32> -> vector<32x216xf32>
    %4 = vector.extract_strided_slice %3 {offsets = [0, 0], sizes = [32, 24], strides = [1, 1]} : vector<32x216xf32> to vector<32x24xf32>
    %5 = vector.shape_cast %4 : vector<32x24xf32> to vector<2x16x24xf32>
    %cst_4 = arith.constant dense<0.000000e+00> : vector<2x16x16xf32>
    %6 = tpu.matmul %5, %0, %cst_4 {dimension_numbers = #tpu.dot_dimension_numbers<[2], [2], [1], [1], [0, 0, 0, 1, 1, 1], [0], [0]>} : vector<2x16x24xf32>, vector<2x16x24xf32>, vector<2x16x16xf32> -> vector<2x16x16xf32>
    %c0_5 = arith.constant 0 : index
    %c0_6 = arith.constant 0 : index
    %c0_7 = arith.constant 0 : index
    %7 = vector.load %arg3[%c0_5, %c0_6, %c0_7] : memref<2x16x144xf32, #tpu.memory_space<vmem>>, vector<2x16x16xf32>
    tpu.vector_store %arg3[%c0_5, %c0_6, %c0_7], %6 {strides = array<i32>} : memref<2x16x144xf32, #tpu.memory_space<vmem>>, vector<2x16x16xf32>,
    %8 = vector.extract_strided_slice %3 {offsets = [0, 24], sizes = [32, 24], strides = [1, 1]} : vector<32x216xf32> to vector<32x24xf32>
    %9 = vector.shape_cast %8 : vector<32x24xf32> to vector<2x16x24xf32>
    %cst_8 = arith.constant dense<0.000000e+00> : vector<2x16x16xf32>
    %10 = tpu.matmul %9, %0, %cst_8 {dimension_numbers = #tpu.dot_dimension_numbers<[2], [2], [1], [1], [0, 0, 0, 1, 1, 1], [0], [0]>} : vector<2x16x24xf32>, vector<2x16x24xf32>, vector<2x16x16xf32> -> vector<2x16x16xf32>
    %c0_9 = arith.constant 0 : index
    %c0_10 = arith.constant 0 : index
    %c16 = arith.constant 16 : index
    %11 = vector.load %arg3[%c0_9, %c0_10, %c16] : memref<2x16x144xf32, #tpu.memory_space<vmem>>, vector<2x16x16xf32>
    tpu.vector_store %arg3[%c0_9, %c0_10, %c16], %10 {strides = array<i32>} : memref<2x16x144xf32, #tpu.memory_space<vmem>>, vector<2x16x16xf32>,
    %12 = vector.extract_strided_slice %3 {offsets = [0, 48], sizes = [32, 24], strides = [1, 1]} : vector<32x216xf32> to vector<32x24xf32>
    %13 = vector.shape_cast %12 : vector<32x24xf32> to vector<2x16x24xf32>
    %cst_11 = arith.constant dense<0.000000e+00> : vector<2x16x16xf32>
    %14 = tpu.matmul %13, %0, %cst_11 {dimension_numbers = #tpu.dot_dimension_numbers<[2], [2], [1], [1], [0, 0, 0, 1, 1, 1], [0], [0]>} : vector<2x16x24xf32>, vector<2x16x24xf32>, vector<2x16x16xf32> -> vector<2x16x16xf32>
    %c0_12 = arith.constant 0 : index
    %c0_13 = arith.constant 0 : index
    %c32 = arith.constant 32 : index
    %15 = vector.load %arg3[%c0_12, %c0_13, %c32] : memref<2x16x144xf32, #tpu.memory_space<vmem>>, vector<2x16x16xf32>
    tpu.vector_store %arg3[%c0_12, %c0_13, %c32], %14 {strides = array<i32>} : memref<2x16x144xf32, #tpu.memory_space<vmem>>, vector<2x16x16xf32>,
    %16 = vector.extract_strided_slice %3 {offsets = [0, 72], sizes = [32, 24], strides = [1, 1]} : vector<32x216xf32> to vector<32x24xf32>
    %17 = vector.shape_cast %16 : vector<32x24xf32> to vector<2x16x24xf32>
    %cst_14 = arith.constant dense<0.000000e+00> : vector<2x16x16xf32>
    %18 = tpu.matmul %17, %0, %cst_14 {dimension_numbers = #tpu.dot_dimension_numbers<[2], [2], [1], [1], [0, 0, 0, 1, 1, 1], [0], [0]>} : vector<2x16x24xf32>, vector<2x16x24xf32>, vector<2x16x16xf32> -> vector<2x16x16xf32>
    %c0_15 = arith.constant 0 : index
    %c0_16 = arith.constant 0 : index
    %c48 = arith.constant 48 : index
    %19 = vector.load %arg3[%c0_15, %c0_16, %c48] : memref<2x16x144xf32, #tpu.memory_space<vmem>>, vector<2x16x16xf32>
    tpu.vector_store %arg3[%c0_15, %c0_16, %c48], %18 {strides = array<i32>} : memref<2x16x144xf32, #tpu.memory_space<vmem>>, vector<2x16x16xf32>,
    %20 = vector.extract_strided_slice %3 {offsets = [0, 96], sizes = [32, 24], strides = [1, 1]} : vector<32x216xf32> to vector<32x24xf32>
    %21 = vector.shape_cast %20 : vector<32x24xf32> to vector<2x16x24xf32>
    %cst_17 = arith.constant dense<0.000000e+00> : vector<2x16x16xf32>
    %22 = tpu.matmul %21, %0, %cst_17 {dimension_numbers = #tpu.dot_dimension_numbers<[2], [2], [1], [1], [0, 0, 0, 1, 1, 1], [0], [0]>} : vector<2x16x24xf32>, vector<2x16x24xf32>, vector<2x16x16xf32> -> vector<2x16x16xf32>
    %c0_18 = arith.constant 0 : index
    %c0_19 = arith.constant 0 : index
    %c64 = arith.constant 64 : index
    %23 = vector.load %arg3[%c0_18, %c0_19, %c64] : memref<2x16x144xf32, #tpu.memory_space<vmem>>, vector<2x16x16xf32>
    tpu.vector_store %arg3[%c0_18, %c0_19, %c64], %22 {strides = array<i32>} : memref<2x16x144xf32, #tpu.memory_space<vmem>>, vector<2x16x16xf32>,
    %24 = vector.extract_strided_slice %3 {offsets = [0, 120], sizes = [32, 24], strides = [1, 1]} : vector<32x216xf32> to vector<32x24xf32>
    %25 = vector.shape_cast %24 : vector<32x24xf32> to vector<2x16x24xf32>
    %cst_20 = arith.constant dense<0.000000e+00> : vector<2x16x16xf32>
    %26 = tpu.matmul %25, %0, %cst_20 {dimension_numbers = #tpu.dot_dimension_numbers<[2], [2], [1], [1], [0, 0, 0, 1, 1, 1], [0], [0]>} : vector<2x16x24xf32>, vector<2x16x24xf32>, vector<2x16x16xf32> -> vector<2x16x16xf32>
    %c0_21 = arith.constant 0 : index
    %c0_22 = arith.constant 0 : index
    %c80 = arith.constant 80 : index
    %27 = vector.load %arg3[%c0_21, %c0_22, %c80] : memref<2x16x144xf32, #tpu.memory_space<vmem>>, vector<2x16x16xf32>
    tpu.vector_store %arg3[%c0_21, %c0_22, %c80], %26 {strides = array<i32>} : memref<2x16x144xf32, #tpu.memory_space<vmem>>, vector<2x16x16xf32>,
    %28 = vector.extract_strided_slice %3 {offsets = [0, 144], sizes = [32, 24], strides = [1, 1]} : vector<32x216xf32> to vector<32x24xf32>
    %29 = vector.shape_cast %28 : vector<32x24xf32> to vector<2x16x24xf32>
    %cst_23 = arith.constant dense<0.000000e+00> : vector<2x16x16xf32>
    %30 = tpu.matmul %29, %0, %cst_23 {dimension_numbers = #tpu.dot_dimension_numbers<[2], [2], [1], [1], [0, 0, 0, 1, 1, 1], [0], [0]>} : vector<2x16x24xf32>, vector<2x16x24xf32>, vector<2x16x16xf32> -> vector<2x16x16xf32>
    %c0_24 = arith.constant 0 : index
    %c0_25 = arith.constant 0 : index
    %c96 = arith.constant 96 : index
    %31 = vector.load %arg3[%c0_24, %c0_25, %c96] : memref<2x16x144xf32, #tpu.memory_space<vmem>>, vector<2x16x16xf32>
    tpu.vector_store %arg3[%c0_24, %c0_25, %c96], %30 {strides = array<i32>} : memref<2x16x144xf32, #tpu.memory_space<vmem>>, vector<2x16x16xf32>,
    %32 = vector.extract_strided_slice %3 {offsets = [0, 168], sizes = [32, 24], strides = [1, 1]} : vector<32x216xf32> to vector<32x24xf32>
    %33 = vector.shape_cast %32 : vector<32x24xf32> to vector<2x16x24xf32>
    %cst_26 = arith.constant dense<0.000000e+00> : vector<2x16x16xf32>
    %34 = tpu.matmul %33, %0, %cst_26 {dimension_numbers = #tpu.dot_dimension_numbers<[2], [2], [1], [1], [0, 0, 0, 1, 1, 1], [0], [0]>} : vector<2x16x24xf32>, vector<2x16x24xf32>, vector<2x16x16xf32> -> vector<2x16x16xf32>
    %c0_27 = arith.constant 0 : index
    %c0_28 = arith.constant 0 : index
    %c112 = arith.constant 112 : index
    %35 = vector.load %arg3[%c0_27, %c0_28, %c112] : memref<2x16x144xf32, #tpu.memory_space<vmem>>, vector<2x16x16xf32>
    tpu.vector_store %arg3[%c0_27, %c0_28, %c112], %34 {strides = array<i32>} : memref<2x16x144xf32, #tpu.memory_space<vmem>>, vector<2x16x16xf32>,
    %36 = vector.extract_strided_slice %3 {offsets = [0, 192], sizes = [32, 24], strides = [1, 1]} : vector<32x216xf32> to vector<32x24xf32>
    %37 = vector.shape_cast %36 : vector<32x24xf32> to vector<2x16x24xf32>
    %cst_29 = arith.constant dense<0.000000e+00> : vector<2x16x16xf32>
    %38 = tpu.matmul %37, %0, %cst_29 {dimension_numbers = #tpu.dot_dimension_numbers<[2], [2], [1], [1], [0, 0, 0, 1, 1, 1], [0], [0]>} : vector<2x16x24xf32>, vector<2x16x24xf32>, vector<2x16x16xf32> -> vector<2x16x16xf32>
    %c0_30 = arith.constant 0 : index
    %c0_31 = arith.constant 0 : index
    %c128 = arith.constant 128 : index
    %39 = vector.load %arg3[%c0_30, %c0_31, %c128] : memref<2x16x144xf32, #tpu.memory_space<vmem>>, vector<2x16x16xf32>
    tpu.vector_store %arg3[%c0_30, %c0_31, %c128], %38 {strides = array<i32>} : memref<2x16x144xf32, #tpu.memory_space<vmem>>, vector<2x16x16xf32>,
    return
  }
  func.func @transform_0(%arg0: i32) -> (i32, i32, i32) {
    %c0_i32 = arith.constant 0 : i32
    %c0_i32_0 = arith.constant 0 : i32
    %c0_i32_1 = arith.constant 0 : i32
    return %arg0, %c0_i32, %c0_i32_0 : i32, i32, i32
  }
  func.func @transform_1(%arg0: i32) -> (i32, i32) {
    %c0_i32 = arith.constant 0 : i32
    %c0_i32_0 = arith.constant 0 : i32
    %c0_i32_1 = arith.constant 0 : i32
    return %c0_i32, %c0_i32_0 : i32, i32
  }
  func.func @transform_2(%arg0: i32) -> (i32, i32, i32) {
    %c0_i32 = arith.constant 0 : i32
    %c0_i32_0 = arith.constant 0 : i32
    %c0_i32_1 = arith.constant 0 : i32
    return %arg0, %c0_i32, %c0_i32_0 : i32, i32, i32
  }
}

</mosaic_0001>

<bundles_post_ra>
// kernel: tpu_custom_call.1
= control target key start
LH: loop header
LB: loop body
LE: loop exit
PB: predicated region body
PF: predicated region fallthrough
CT: control target
= control target key end

     0   :  { %7 = vsyncpa [#allocation3], 0  ;;  %s1311_s0 = inlined_call_operand.hbm [shape: f32[2,16,24], index: 0, kind: input, shape index: {}]   ;;  %s1312_s1 = inlined_call_operand.hbm [shape: f32[24,216], index: 1, kind: input, shape index: {}]   ;;  %s1313_s2 = inlined_call_operand.hbm [shape: f32[2,16,144], index: 2, kind: output, shape index: {}]  }
   0x1   :  { %8 = vsyncpa [#allocation6], 0 }
   0x2   :  { %9 = vsyncpa [#allocation4], 0  ;;  %s14_s11 = sshll.u32 %s1311_s0, 4  ;;  %s1052_s12 = smov [#allocation2]   ;;  %s15_s11 = int_to_ptr.hbm [resolvable:$true] %s14_s11 }
   0x3   :  { %s16_s13 = sshll.u32 %s1052_s12, 4  ;;  %s27_s16 = sshll.u32 %s1312_s1, 4  ;;  %s17_s13 = int_to_ptr.vmem [resolvable:$true] %s16_s13  ;;  %s28_s16 = int_to_ptr.hbm [resolvable:$true] %s27_s16 }
   0x4   :  { %s1053_s17 = smov 128   ;;  %s1054_s18 = smov 8  }
   0x5   :  { %22 = dma.hbm_to_vmem [thread:$0]  %s15_s11, 512, %s17_s13, [#allocation3], %s1053_s17, %s1053_s17, %s1054_s18  }
   0x6   :  { %s1055_s19 = smov [#allocation5]   ;;  %s1056_s21 = smov 256  }
   0x7   :  { %s29_s20 = sshll.u32 %s1055_s19, 4  ;;  %s1057_s22 = smov 16   ;;  %s30_s20 = int_to_ptr.vmem [resolvable:$true] %s29_s20 }
   0x8   :  { %35 = dma.hbm_to_vmem [thread:$0]  %s28_s16, 768, %s30_s20, [#allocation6], %s1056_s21, %s1056_s21, %s1057_s22  }
   0x9   :  { %1046 = dma.done.wait [#allocation3], 512  }
   0xa   :  { %1047 = vsyncadd [#allocation3], 4294966784 }
   0xb   :  { %1048 = dma.done.wait [#allocation6], 768  }
   0xc   :  { %1049 = vsyncadd [#allocation6], 4294966528  ;;  %v52_v0 = vld [vmem:[#allocation5 + $0x20] sm:$0xff]  ;;  %v50_v1 = vld [vmem:[#allocation5 + $0x10] sm:$0xff]  ;;  %vm54_vm0 = vcmask 195584   ;;  %s1058_s0 = smov 56  }
   0xd   :  { %80 = vmatpush.msra.mxu0 %v52_v0  ;;  %952 = vmatpush.msra.mxu2 %v52_v0  ;;  %v48_v2 = vld [vmem:[#allocation5] sm:$0xff]  ;;  %v53_v3 = vld [vmem:[#allocation5 + $0x28] sm:$0xff]  ;;  %v1095_v5 = vld [vmem:[#allocation2 + $0x18] sm:$0xff]  ;;  %s1059_s1 = smov 104   ;;  %s1060_s23 = smov 80   ;;  %vm183_vm1 = vcmask 130048  }
   0xe   :  { %v1093_v4 = vld [vmem:[#allocation2] sm:$0xff]  ;;  %109 = vmatpush.msra.mxu1 %v53_v3  ;;  %v51_v6 = vld [vmem:[#allocation5 + $0x18] sm:$0xff]  ;;  %955 = vmatpush.msra.mxu3 %v53_v3  ;;  %v49_v7 = vld [vmem:[#allocation5 + $0x8] sm:$0xff]  ;;  %s1061_s24 = smov 32   ;;  %s1062_s25 = smov 112   ;;  %vm530_vm2 = vcmask 64512  }
   0xf   :  { %81 = vmatpush.msra.mxu0 %v50_v1  ;;  %953 = vmatpush.msra.mxu2 %v50_v1  ;;  %v1101_v8 = vld [vmem:[#allocation2 + $0x8] sm:$0xff]  ;;  %v1125_v9 = vld [vmem:[#allocation2 + $0x10] sm:$0xff]  ;;  %s1063_s26 = smov 88   ;;  %s1064_s27 = smov 64   ;;  %vm266_vm3 = vcmask 261248   ;;  %vm349_vm4 = vcmask 392448  }
  0x10   :  { %110 = vmatpush.msra.mxu1 %v51_v6  ;;  %956 = vmatpush.msra.mxu3 %v51_v6  ;;  %s1065_s28 = smov 48   ;;  %s1066_s29 = smov 96   ;;  %vm432_vm5 = vcmask 523648   ;;  %vm515_vm6 = vcmask 654848   ;;  %vm615_vm7 = vcmask 786048   ;;  %vm698_vm8 = vcmask 917248  }
  0x11   :  { %82 = vmatpush.msra.mxu0 %v48_v2  ;;  %954 = vmatpush.msra.mxu2 %v48_v2  ;;  %vm781_vm9 = vcmask 1048448   ;;  %s1067_s30 = smov [#allocation7]   ;;  %s858_s6 = sshll.u32 %s1313_s2, 4  ;;  %s859_s6 = int_to_ptr.hbm [resolvable:$true] %s858_s6 }
  0x12   :  { %872 = vmatmul.msk.f32.vlgmr.msra.gmra.mxu0 %vm54_vm0, %v1093_v4  ;;  %875 = vmatmul.msk.f32.vlgmr.msra.gmra.mxu2 %vm54_vm0, %v1095_v5  ;;  %s856_s3 = sshll.u32 %s1067_s30, 4  ;;  %s857_s3 = int_to_ptr.vmem [resolvable:$true] %s856_s3 }
  0x13   :  { %880 = vmatpush.xpose.msk.msrb.mxu2 %vm54_vm0, %v1101_v8  ;;  %896 = vmatpush.xpose.msk.msrb.mxu0 %vm54_vm0, %v1101_v8 }
  0x14   :  { %111 = vmatpush.msra.mxu1 %v49_v7  ;;  %957 = vmatpush.msra.mxu3 %v49_v7 }
  0x15   :  { %876 = vmatmul.msk.f32.vlgmr.msra.gmra.mxu1 %vm54_vm0, %v1093_v4  ;;  %879 = vmatmul.msk.f32.vlgmr.msra.gmra.mxu3 %vm54_vm0, %v1095_v5 }
  0x16   :  { %884 = vmatpush.xpose.msk.msrb.mxu3 %vm54_vm0, %v1095_v5  ;;  %900 = vmatpush.xpose.msk.msrb.mxu1 %vm54_vm0, %v1095_v5 }
  0x17   :  { %881 = vmatpush.xpose.msk.msrb.mxu2 %vm54_vm0, %v1093_v4  ;;  %897 = vmatpush.xpose.msk.msrb.mxu0 %vm54_vm0, %v1093_v4 }
  0x1a   :  { %873 = vmatmul.msk.f32.gmra.mxu0 %vm54_vm0, %v1101_v8  ;;  %885 = vmatpush.xpose.msk.msrb.mxu3 %vm54_vm0, %v1125_v9 }
  0x1b   :  { %888 = vmatpush.xpose.msk.msra.mxu2 %vm54_vm0, %v1101_v8  ;;  %912 = vmatpush.xpose.msk.msra.mxu0 %vm54_vm0, %v1101_v8 }
  0x1c   :  { %901 = vmatpush.xpose.msk.msrb.mxu1 %vm54_vm0, %v1125_v9 }
  0x1d   :  { %877 = vmatmul.msk.f32.gmra.mxu1 %vm54_vm0, %v1101_v8 }
  0x1e   :  { %892 = vmatpush.xpose.msk.msra.mxu3 %vm54_vm0, %v1095_v5 }
  0x1f   :  { %889 = vmatpush.xpose.msk.msra.mxu2 %vm54_vm0, %v1093_v4  ;;  %913 = vmatpush.xpose.msk.msra.mxu0 %vm54_vm0, %v1093_v4 }
  0x20   :  { %916 = vmatpush.xpose.msk.msra.mxu1 %vm54_vm0, %v1095_v5 }
  0x22   :  { %893 = vmatpush.xpose.msk.msra.mxu3 %vm54_vm0, %v1125_v9  ;;  %874 = vmatmul.msk.f32.gmra.mxu0 %vm54_vm0, %v1125_v9 }
  0x24   :  { %917 = vmatpush.xpose.msk.msra.mxu1 %vm54_vm0, %v1125_v9 }
  0x25   :  { %878 = vmatmul.msk.f32.gmra.mxu1 %vm54_vm0, %v1125_v9 }
  0x8f   :  { %v84_v10 = vpop.f32.mrf.mxu0 }
  0x90   :  { %354 = vrot.lane.b32.xlu2 %v84_v10, %s1058_s0  ;;  %188 = vrot.lane.b32.xlu0 %v84_v10, %s1059_s1 }
  0x91   :  { %882 = vmatmul.msk.f32.vlgmr.msrb.gmra.mxu2 %vm54_vm0, %v84_v10 }
  0x92   :  { %904 = vmatpush.xpose.msk.msrb.mxu2 %vm54_vm0, %v1101_v8  ;;  %v113_v14 = vpop.f32.mrf.mxu1 }
  0x95   :  { %v93_v11 = vpop.f32.mrf.mxu2 }
  0x96   :  { %221 = vrot.lane.b32.xlu1 %v93_v11, %s1059_s1  ;;  %905 = vmatpush.xpose.msk.msrb.mxu2 %vm54_vm0, %v1093_v4 }
  0x97   :  { %v87_v12 = vpop.f32.mrf.mxu0 }
  0x98   :  { %271 = vrot.lane.b32.xlu0 %v84_v10, %s1060_s23  ;;  %356 = vrot.lane.b32.xlu2 %v87_v12, %s1058_s0  ;;  %v122_v17 = vpop.f32.mrf.mxu3 }
  0x99   :  { %883 = vmatmul.msk.f32.gmra.mxu2 %vm54_vm0, %v87_v12 }
  0x9a   :  { %v116_v15 = vpop.f32.mrf.mxu1 }
  0x9e   :  { %190 = vrot.lane.b32.xlu1 %v87_v12, %s1059_s1 }
  0x9f   :  { %v90_v13 = vpop.f32.mrf.mxu0 }
  0xa0   :  { %304 = vrot.lane.b32.xlu2 %v93_v11, %s1060_s23  ;;  %219 = vrot.lane.b32.xlu0 %v90_v13, %s1059_s1 }
  0xa1   :  { %886 = vmatmul.msk.f32.vlgmr.msrb.gmra.mxu3 %vm54_vm0, %v90_v13 }
  0xa2   :  { %908 = vmatpush.xpose.msk.msrb.mxu3 %vm54_vm0, %v1095_v5  ;;  %v119_v16 = vpop.f32.mrf.mxu1 }
  0xa6   :  { %273 = vrot.lane.b32.xlu1 %v87_v12, %s1060_s23  ;;  %909 = vmatpush.xpose.msk.msrb.mxu3 %vm54_vm0, %v1125_v9 }
  0xa8   :  { %385 = vrot.lane.b32.xlu2 %v90_v13, %s1058_s0  ;;  %387 = vrot.lane.b32.xlu0 %v93_v11, %s1058_s0 }
  0xa9   :  { %887 = vmatmul.msk.f32.gmra.mxu3 %vm54_vm0, %v93_v11 }
  0xae   :  { %524 = vrot.lane.b32.xlu1 %v113_v14, %s1054_s18 }
  0xb0   :  { %566 = vrot.lane.b32.xlu2 %v93_v11, %s1054_s18  ;;  %522 = vrot.lane.b32.xlu0 %v84_v10, %s1054_s18 }
  0xb6   :  { %437 = vrot.lane.b32.xlu1 %v84_v10, %s1061_s24 }
  0xb8   :  { %562 = vrot.lane.b32.xlu2 %v90_v13, %s1054_s18  ;;  %526 = vrot.lane.b32.xlu0 %v87_v12, %s1054_s18 }
  0xbe   :  { %302 = vrot.lane.b32.xlu1 %v90_v13, %s1060_s23 }
  0xc0   :  { %468 = vrot.lane.b32.xlu2 %v90_v13, %s1061_s24  ;;  %564 = vrot.lane.b32.xlu0 %v119_v16, %s1054_s18 }
  0xc6   :  { %528 = vrot.lane.b32.xlu1 %v116_v15, %s1054_s18 }
  0xc8   :  { %470 = vrot.lane.b32.xlu2 %v93_v11, %s1061_s24  ;;  %568 = vrot.lane.b32.xlu0 %v122_v17, %s1054_s18 }
  0xce   :  { %439 = vrot.lane.b32.xlu1 %v87_v12, %s1061_s24 }
  0xd0   :  { %620 = vrot.lane.b32.xlu2 %v113_v14, %s1062_s25  ;;  %703 = vrot.lane.b32.xlu0 %v113_v14, %s1063_s26 }
  0xd6   :  { %734 = vrot.lane.b32.xlu1 %v119_v16, %s1063_s26 }
  0xd8   :  { %736 = vrot.lane.b32.xlu2 %v122_v17, %s1063_s26  ;;  %651 = vrot.lane.b32.xlu0 %v119_v16, %s1062_s25 }
  0xde   :  { %705 = vrot.lane.b32.xlu1 %v116_v15, %s1063_s26 }
  0xe0   :  { %786 = vrot.lane.b32.xlu2 %v113_v14, %s1064_s27  ;;  %622 = vrot.lane.b32.xlu0 %v116_v15, %s1062_s25 }
  0xe6   :  { %653 = vrot.lane.b32.xlu1 %v122_v17, %s1062_s25 }
  0xe8   :  { %819 = vrot.lane.b32.xlu2 %v122_v17, %s1064_s27  ;;  %817 = vrot.lane.b32.xlu0 %v119_v16, %s1064_s27 }
  0xea   :  { %v355_v18 = vpop.permute.xlu2 %354 }
  0xee   :  { %788 = vrot.lane.b32.xlu1 %v116_v15, %s1064_s27 }
  0xf2   :  { %v357_v19 = vpop.permute.xlu2 %356 }
  0xfa   :  { %v305_v22 = vpop.permute.xlu2 %304 }
 0x102   :  { %v189_v20 = vpop.permute.xlu0 %188  ;;  %v386_v26 = vpop.permute.xlu2 %385 }
 0x103   :  { %890 = vmatmul.msk.f32.vlgmr.msra.gmra.mxu2 %vm54_vm0, %v189_v20 }
 0x104   :  { %920 = vmatpush.xpose.msk.msra.mxu2 %vm54_vm0, %v1101_v8 }
 0x108   :  { %v222_v21 = vpop.permute.xlu1 %221  ;;  %921 = vmatpush.xpose.msk.msra.mxu2 %vm54_vm0, %v1093_v4 }
 0x10a   :  { %v272_v23 = vpop.permute.xlu0 %271  ;;  %v567_v31 = vpop.permute.xlu2 %566 }
 0x10b   :  { %898 = vmatmul.msk.f32.vlgmr.msrb.gmra.mxu0 %vm54_vm0, %v272_v23 }
 0x10c   :  { %928 = vmatpush.xpose.msk.msrb.mxu0 %vm54_vm0, %v1101_v8 }
 0x110   :  { %v191_v24 = vpop.permute.xlu1 %190  ;;  %929 = vmatpush.xpose.msk.msrb.mxu0 %vm54_vm0, %v1093_v4 }
 0x111   :  { %891 = vmatmul.msk.f32.gmra.mxu2 %vm54_vm0, %v191_v24 }
 0x112   :  { %v220_v25 = vpop.permute.xlu0 %219  ;;  %v563_v35 = vpop.permute.xlu2 %562 }
 0x113   :  { %894 = vmatmul.msk.f32.vlgmr.msra.gmra.mxu3 %vm54_vm0, %v220_v25 }
 0x114   :  { %v148_v27 = vpop.f32.mrf.mxu2  ;;  %924 = vmatpush.xpose.msk.msra.mxu3 %vm54_vm0, %v1095_v5 }
 0x115   :  { %184 = vst.msk [vmem:[#allocation7] sm:$0xff] %vm183_vm1, %v148_v27 }
 0x118   :  { %v274_v28 = vpop.permute.xlu1 %273  ;;  %925 = vmatpush.xpose.msk.msra.mxu3 %vm54_vm0, %v1125_v9 }
 0x119   :  { %899 = vmatmul.msk.f32.gmra.mxu0 %vm54_vm0, %v274_v28  ;;  %906 = vmatmul.msk.f32.vlgmr.msrb.gmra.mxu2 %vm54_vm0, %v355_v18 }
 0x11a   :  { %v388_v29 = vpop.permute.xlu0 %387  ;;  %936 = vmatpush.xpose.msk.msrb.mxu2 %vm54_vm0, %v1101_v8  ;;  %v469_v41 = vpop.permute.xlu2 %468 }
 0x11b   :  { %895 = vmatmul.msk.f32.gmra.mxu3 %vm54_vm0, %v222_v21 }
 0x11c   :  { %v151_v30 = vpop.f32.mrf.mxu2 }
 0x11d   :  { %185 = vst.msk [vmem:[#allocation7 + $0x10] sm:$0xff] %vm183_vm1, %v151_v30 }
 0x11e   :  { %937 = vmatpush.xpose.msk.msrb.mxu2 %vm54_vm0, %v1093_v4 }
 0x120   :  { %v525_v32 = vpop.permute.xlu1 %524 }
 0x121   :  { %907 = vmatmul.msk.f32.gmra.mxu2 %vm54_vm0, %v357_v19 }
 0x122   :  { %v523_v33 = vpop.permute.xlu0 %522  ;;  %v471_v48 = vpop.permute.xlu2 %470 }
 0x123   :  { %910 = vmatmul.msk.f32.vlgmr.msrb.gmra.mxu3 %vm54_vm0, %v386_v26  ;;  %v531_v36 = vsel %vm530_vm2, %v523_v33, %v525_v32 }
 0x124   :  { %v177_v34 = vpop.f32.mrf.mxu3  ;;  %940 = vmatpush.xpose.msk.msrb.mxu3 %vm54_vm0, %v1095_v5 }
 0x125   :  { %186 = vst.msk [vmem:[#allocation7 + $0x20] sm:$0xff] %vm183_vm1, %v177_v34 }
 0x128   :  { %v438_v37 = vpop.permute.xlu1 %437  ;;  %941 = vmatpush.xpose.msk.msrb.mxu3 %vm54_vm0, %v1125_v9 }
 0x129   :  { %914 = vmatmul.msk.f32.vlgmr.msra.gmra.mxu0 %vm54_vm0, %v438_v37  ;;  %922 = vmatmul.msk.f32.vlgmr.msra.gmra.mxu2 %vm54_vm0, %v531_v36 }
 0x12a   :  { %v527_v38 = vpop.permute.xlu0 %526  ;;  %944 = vmatpush.xpose.msk.msra.mxu0 %vm54_vm0, %v1101_v8  ;;  %v621_v51 = vpop.permute.xlu2 %620 }
 0x12b   :  { %911 = vmatmul.msk.f32.gmra.mxu3 %vm54_vm0, %v388_v29 }
 0x12c   :  { %v180_v39 = vpop.f32.mrf.mxu3 }
 0x12d   :  { %187 = vst.msk [vmem:[#allocation7 + $0x30] sm:$0xff] %vm183_vm1, %v180_v39 }
 0x12e   :  { %945 = vmatpush.xpose.msk.msra.mxu0 %vm54_vm0, %v1093_v4 }
 0x130   :  { %v303_v40 = vpop.permute.xlu1 %302 }
 0x131   :  { %902 = vmatmul.msk.f32.vlgmr.msrb.gmra.mxu1 %vm54_vm0, %v303_v40 }
 0x132   :  { %v565_v42 = vpop.permute.xlu0 %564  ;;  %932 = vmatpush.xpose.msk.msrb.mxu1 %vm54_vm0, %v1095_v5  ;;  %v737_v54 = vpop.permute.xlu2 %736 }
 0x133   :  { %v570_v43 = vsel %vm530_vm2, %v563_v35, %v565_v42 }
 0x134   :  { %926 = vmatmul.msk.f32.vlgmr.msra.gmra.mxu3 %vm54_vm0, %v570_v43 }
 0x136   :  { %933 = vmatpush.xpose.msk.msrb.mxu1 %vm54_vm0, %v1125_v9 }
 0x138   :  { %v529_v44 = vpop.permute.xlu1 %528 }
 0x139   :  { %903 = vmatmul.msk.f32.gmra.mxu1 %vm54_vm0, %v305_v22  ;;  %v532_v45 = vsel %vm530_vm2, %v527_v38, %v529_v44 }
 0x13a   :  { %923 = vmatmul.msk.f32.gmra.mxu2 %vm54_vm0, %v532_v45  ;;  %v569_v46 = vpop.permute.xlu0 %568  ;;  %v787_v58 = vpop.permute.xlu2 %786 }
 0x13b   :  { %v571_v47 = vsel %vm530_vm2, %v567_v31, %v569_v46 }
 0x13c   :  { %927 = vmatmul.msk.f32.gmra.mxu3 %vm54_vm0, %v571_v47 }
 0x140   :  { %v440_v49 = vpop.permute.xlu1 %439 }
 0x141   :  { %915 = vmatmul.msk.f32.gmra.mxu0 %vm54_vm0, %v440_v49  ;;  %918 = vmatmul.msk.f32.vlgmr.msra.gmra.mxu1 %vm54_vm0, %v469_v41 }
 0x142   :  { %v704_v50 = vpop.permute.xlu0 %703  ;;  %948 = vmatpush.xpose.msk.msra.mxu1 %vm54_vm0, %v1095_v5  ;;  %v820_v61 = vpop.permute.xlu2 %819 }
 0x143   :  { %938 = vmatmul.msk.f32.vlgmr.msrb.gmra.mxu2 %vm54_vm0, %v704_v50 }
 0x146   :  { %949 = vmatpush.xpose.msk.msra.mxu1 %vm54_vm0, %v1125_v9 }
 0x148   :  { %v735_v52 = vpop.permute.xlu1 %734 }
 0x149   :  { %919 = vmatmul.msk.f32.gmra.mxu1 %vm54_vm0, %v471_v48  ;;  %930 = vmatmul.msk.f32.vlgmr.msrb.gmra.mxu0 %vm54_vm0, %v621_v51 }
 0x14a   :  { %942 = vmatmul.msk.f32.vlgmr.msrb.gmra.mxu3 %vm54_vm0, %v735_v52  ;;  %v652_v53 = vpop.permute.xlu0 %651 }
 0x150   :  { %v706_v55 = vpop.permute.xlu1 %705 }
 0x151   :  { %934 = vmatmul.msk.f32.vlgmr.msrb.gmra.mxu1 %vm54_vm0, %v652_v53  ;;  %939 = vmatmul.msk.f32.gmra.mxu2 %vm54_vm0, %v706_v55 }
 0x152   :  { %943 = vmatmul.msk.f32.gmra.mxu3 %vm54_vm0, %v737_v54  ;;  %v623_v56 = vpop.permute.xlu0 %622 }
 0x153   :  { %931 = vmatmul.msk.f32.gmra.mxu0 %vm54_vm0, %v623_v56 }
 0x158   :  { %v654_v57 = vpop.permute.xlu1 %653 }
 0x159   :  { %935 = vmatmul.msk.f32.gmra.mxu1 %vm54_vm0, %v654_v57 }
 0x15a   :  { %v818_v59 = vpop.permute.xlu0 %817 }
 0x15b   :  { %946 = vmatmul.msk.f32.vlgmr.msra.gmra.mxu0 %vm54_vm0, %v787_v58 }
 0x160   :  { %v789_v60 = vpop.permute.xlu1 %788 }
 0x161   :  { %950 = vmatmul.msk.f32.vlgmr.msra.gmra.mxu1 %vm54_vm0, %v818_v59 }
 0x163   :  { %947 = vmatmul.msk.f32.gmra.mxu0 %vm54_vm0, %v789_v60 }
 0x169   :  { %951 = vmatmul.msk.f32.gmra.mxu1 %vm54_vm0, %v820_v61 }
 0x186   :  { %v213_v62 = vpop.f32.mrf.mxu2 }
 0x187   :  { %254 = vrot.lane.b32.xlu0 %v213_v62, %s1057_s22 }
 0x188   :  { %v296_v63 = vpop.f32.mrf.mxu0 }
 0x189   :  { %337 = vrot.lane.b32.xlu1 %v296_v63, %s1061_s24 }
 0x194   :  { %v216_v0 = vpop.f32.mrf.mxu2 }
 0x195   :  { %256 = vrot.lane.b32.xlu1 %v216_v0, %s1057_s22 }
 0x196   :  { %v299_v1 = vpop.f32.mrf.mxu0  ;;  %v244_v2 = vpop.f32.mrf.mxu3 }
 0x197   :  { %339 = vrot.lane.b32.xlu2 %v299_v1, %s1061_s24 }
 0x19c   :  { %v379_v3 = vpop.f32.mrf.mxu2 }
 0x19e   :  { %v247_v5 = vpop.f32.mrf.mxu3 }
 0x19f   :  { %258 = vrot.lane.b32.xlu2 %v244_v2, %s1057_s22 }
 0x1a4   :  { %v382_v11 = vpop.f32.mrf.mxu2 }
 0x1a6   :  { %v462_v6 = vpop.f32.mrf.mxu0  ;;  %v410_v10 = vpop.f32.mrf.mxu3 }
 0x1a7   :  { %420 = vrot.lane.b32.xlu2 %v379_v3, %s1065_s28 }
 0x1ac   :  { %v554_v15 = vpop.f32.mrf.mxu2 }
 0x1ae   :  { %v327_v4 = vpop.f32.mrf.mxu1  ;;  %v413_v14 = vpop.f32.mrf.mxu3 }
 0x1af   :  { %341 = vrot.lane.b32.xlu0 %v327_v4, %s1061_s24 }
 0x1b6   :  { %v330_v7 = vpop.f32.mrf.mxu1 }
 0x1b7   :  { %343 = vrot.lane.b32.xlu1 %v330_v7, %s1061_s24  ;;  %503 = vrot.lane.b32.xlu0 %v462_v6, %s1064_s27  ;;  %v593_v18 = vpop.f32.mrf.mxu3 }
 0x1bd   :  { %v557_v19 = vpop.f32.mrf.mxu2 }
 0x1be   :  { %v465_v8 = vpop.f32.mrf.mxu0  ;;  %v493_v9 = vpop.f32.mrf.mxu1 }
 0x1bf   :  { %505 = vrot.lane.b32.xlu1 %v465_v8, %s1064_s27  ;;  %507 = vrot.lane.b32.xlu2 %v493_v9, %s1064_s27  ;;  %v596_v22 = vpop.f32.mrf.mxu3 }
 0x1c0   :  { %260 = vrot.lane.b32.xlu0 %v247_v5, %s1057_s22 }
 0x1c6   :  { %v496_v12 = vpop.f32.mrf.mxu1  ;;  %v645_v13 = vpop.f32.mrf.mxu0 }
 0x1c7   :  { %686 = vrot.lane.b32.xlu2 %v645_v13, %s1066_s29  ;;  %424 = vrot.lane.b32.xlu1 %v410_v10, %s1065_s28  ;;  %v728_v23 = vpop.f32.mrf.mxu2 }
 0x1c8   :  { %422 = vrot.lane.b32.xlu0 %v382_v11, %s1065_s28 }
 0x1cd   :  { %v759_v26 = vpop.f32.mrf.mxu3 }
 0x1ce   :  { %v676_v16 = vpop.f32.mrf.mxu1 }
 0x1cf   :  { %603 = vrot.lane.b32.xlu1 %v554_v15, %s1060_s23  ;;  %426 = vrot.lane.b32.xlu2 %v413_v14, %s1065_s28 }
 0x1d0   :  { %509 = vrot.lane.b32.xlu0 %v496_v12, %s1064_s27  ;;  %v648_v17 = vpop.f32.mrf.mxu0 }
 0x1d4   :  { %v731_v27 = vpop.f32.mrf.mxu2 }
 0x1d5   :  { %v762_v29 = vpop.f32.mrf.mxu3 }
 0x1d6   :  { %v679_v20 = vpop.f32.mrf.mxu1 }
 0x1d7   :  { %690 = vrot.lane.b32.xlu1 %v676_v16, %s1066_s29  ;;  %605 = vrot.lane.b32.xlu2 %v557_v19, %s1060_s23 }
 0x1d8   :  { %688 = vrot.lane.b32.xlu0 %v648_v17, %s1066_s29  ;;  %v811_v21 = vpop.f32.mrf.mxu0 }
 0x1d9   :  { %848 = vst.msk [vmem:[#allocation7 + $0x8] sm:$0xff] %vm183_vm1, %v811_v21 }
 0x1de   :  { %v842_v24 = vpop.f32.mrf.mxu1 }
 0x1df   :  { %850 = vst.msk [vmem:[#allocation7 + $0x28] sm:$0xff] %vm183_vm1, %v842_v24  ;;  %692 = vrot.lane.b32.xlu2 %v679_v20, %s1066_s29  ;;  %609 = vrot.lane.b32.xlu1 %v596_v22, %s1060_s23 }
 0x1e0   :  { %607 = vrot.lane.b32.xlu0 %v593_v18, %s1060_s23  ;;  %v814_v25 = vpop.f32.mrf.mxu0 }
 0x1e1   :  { %849 = vst.msk [vmem:[#allocation7 + $0x18] sm:$0xff] %vm183_vm1, %v814_v25 }
 0x1e6   :  { %v845_v28 = vpop.f32.mrf.mxu1 }
 0x1e7   :  { %851 = vst.msk [vmem:[#allocation7 + $0x38] sm:$0xff] %vm183_vm1, %v845_v28  ;;  %771 = vrot.lane.b32.xlu1 %v731_v27, %s1062_s25  ;;  %773 = vrot.lane.b32.xlu2 %v759_v26, %s1062_s25 }
 0x1e8   :  { %769 = vrot.lane.b32.xlu0 %v728_v23, %s1062_s25 }
 0x1f0   :  { %775 = vrot.lane.b32.xlu0 %v762_v29, %s1062_s25 }
 0x1f1   :  { %v340_v30 = vpop.permute.xlu2 %339 }
 0x1f9   :  { %v259_v31 = vpop.permute.xlu2 %258  ;;  %v255_v32 = vpop.permute.xlu0 %254 }
 0x1fa   :  { %269 = vst.msk [vmem:[#allocation7 + $0x20] sm:$0xff] %vm266_vm3, %v259_v31 }
 0x1fb   :  { %267 = vst.msk [vmem:[#allocation7] sm:$0xff] %vm266_vm3, %v255_v32  ;;  %v338_v33 = vpop.permute.xlu1 %337 }
 0x1fc   :  { %350 = vst.msk [vmem:[#allocation7] sm:$0xff] %vm349_vm4, %v338_v33 }
 0x201   :  { %v421_v34 = vpop.permute.xlu2 %420 }
 0x202   :  { %433 = vst.msk [vmem:[#allocation7] sm:$0xff] %vm432_vm5, %v421_v34 }
 0x207   :  { %v257_v35 = vpop.permute.xlu1 %256 }
 0x208   :  { %268 = vst.msk [vmem:[#allocation7 + $0x10] sm:$0xff] %vm266_vm3, %v257_v35 }
 0x209   :  { %351 = vst.msk [vmem:[#allocation7 + $0x10] sm:$0xff] %vm349_vm4, %v340_v30 }
 0x219   :  { %v508_v36 = vpop.permute.xlu2 %507 }
 0x221   :  { %v342_v37 = vpop.permute.xlu0 %341  ;;  %v687_v38 = vpop.permute.xlu2 %686 }
 0x222   :  { %352 = vst.msk [vmem:[#allocation7 + $0x20] sm:$0xff] %vm349_vm4, %v342_v37 }
 0x229   :  { %v344_v39 = vpop.permute.xlu1 %343  ;;  %v504_v40 = vpop.permute.xlu0 %503 }
 0x22a   :  { %516 = vst.msk [vmem:[#allocation7] sm:$0xff] %vm515_vm6, %v504_v40  ;;  %v427_v43 = vpop.permute.xlu2 %426 }
 0x231   :  { %v506_v41 = vpop.permute.xlu1 %505 }
 0x232   :  { %v261_v42 = vpop.permute.xlu0 %260  ;;  %v606_v46 = vpop.permute.xlu2 %605 }
 0x233   :  { %270 = vst.msk [vmem:[#allocation7 + $0x30] sm:$0xff] %vm266_vm3, %v261_v42 }
 0x234   :  { %353 = vst.msk [vmem:[#allocation7 + $0x30] sm:$0xff] %vm349_vm4, %v344_v39 }
 0x235   :  { %436 = vst.msk [vmem:[#allocation7 + $0x30] sm:$0xff] %vm432_vm5, %v427_v43 }
 0x239   :  { %v425_v44 = vpop.permute.xlu1 %424 }
 0x23a   :  { %v423_v45 = vpop.permute.xlu0 %422  ;;  %435 = vst.msk [vmem:[#allocation7 + $0x20] sm:$0xff] %vm432_vm5, %v425_v44  ;;  %v693_v51 = vpop.permute.xlu2 %692 }
 0x23b   :  { %434 = vst.msk [vmem:[#allocation7 + $0x10] sm:$0xff] %vm432_vm5, %v423_v45 }
 0x23c   :  { %517 = vst.msk [vmem:[#allocation7 + $0x10] sm:$0xff] %vm515_vm6, %v506_v41 }
 0x23d   :  { %518 = vst.msk [vmem:[#allocation7 + $0x20] sm:$0xff] %vm515_vm6, %v508_v36 }
 0x23e   :  { %617 = vst.msk [vmem:[#allocation7 + $0x10] sm:$0xff] %vm615_vm7, %v606_v46 }
 0x241   :  { %v604_v47 = vpop.permute.xlu1 %603 }
 0x242   :  { %v510_v48 = vpop.permute.xlu0 %509  ;;  %616 = vst.msk [vmem:[#allocation7] sm:$0xff] %vm615_vm7, %v604_v47  ;;  %v774_v54 = vpop.permute.xlu2 %773 }
 0x243   :  { %519 = vst.msk [vmem:[#allocation7 + $0x30] sm:$0xff] %vm515_vm6, %v510_v48 }
 0x244   :  { %699 = vst.msk [vmem:[#allocation7] sm:$0xff] %vm698_vm8, %v687_v38 }
 0x249   :  { %v691_v49 = vpop.permute.xlu1 %690 }
 0x24a   :  { %v689_v50 = vpop.permute.xlu0 %688 }
 0x24b   :  { %700 = vst.msk [vmem:[#allocation7 + $0x10] sm:$0xff] %vm698_vm8, %v689_v50 }
 0x251   :  { %v610_v52 = vpop.permute.xlu1 %609 }
 0x252   :  { %v608_v53 = vpop.permute.xlu0 %607  ;;  %619 = vst.msk [vmem:[#allocation7 + $0x30] sm:$0xff] %vm615_vm7, %v610_v52 }
 0x253   :  { %618 = vst.msk [vmem:[#allocation7 + $0x20] sm:$0xff] %vm615_vm7, %v608_v53 }
 0x254   :  { %701 = vst.msk [vmem:[#allocation7 + $0x20] sm:$0xff] %vm698_vm8, %v691_v49 }
 0x255   :  { %702 = vst.msk [vmem:[#allocation7 + $0x30] sm:$0xff] %vm698_vm8, %v693_v51 }
 0x256   :  { %784 = vst.msk [vmem:[#allocation7 + $0x20] sm:$0xff] %vm781_vm9, %v774_v54 }
 0x259   :  { %v772_v55 = vpop.permute.xlu1 %771 }
 0x25a   :  { %v770_v56 = vpop.permute.xlu0 %769  ;;  %783 = vst.msk [vmem:[#allocation7 + $0x10] sm:$0xff] %vm781_vm9, %v772_v55 }
 0x25b   :  { %782 = vst.msk [vmem:[#allocation7] sm:$0xff] %vm781_vm9, %v770_v56 }
 0x262   :  { %v776_v57 = vpop.permute.xlu0 %775 }
 0x263   :  { %785 = vst.msk [vmem:[#allocation7 + $0x30] sm:$0xff] %vm781_vm9, %v776_v57 }
 0x264   :  { %864 = dma.vmem_to_hbm [thread:$0]  %s857_s3, 1024, %s859_s6, [#allocation4], %s1056_s21, %s1056_s21, %s1057_s22  }
 0x265   :  { %1050 = dma.done.wait [#allocation4], 1024  }
 0x266   :  { %1051 = vsyncadd [#allocation4], 4294966272 }
 0x267   :  { %869 = vsyncpa [#allocation3], 1 }
 0x268   :  { %870 = vsyncpa [#allocation6], 1 }
 0x269   :  { %871 = vsyncpa [#allocation4], 1 }

</bundles_post_ra>
